<compile_context>
chip_gen: v5e
topology: v5e:2x2
jax: 0.10.0
libtpu: 0.0.40
codegen_flags: <defaults>
</compile_context>

<pallas_src>
import jax
import jax.numpy as jnp
from jax.experimental import pallas as pl
from jax.experimental.pallas import tpu as pltpu


# ------------------------------ kernel helpers ------------------------------

def _leaky_relu(x, slope=0.2):
    return jnp.where(x > 0, x, slope * x)


# ------------------------------ Pallas kernel -------------------------------

def _incompressible_flow_kernel(
    x0t_ref, x1t_ref,                            # activations (d2, TB)
    w1_ref, b1_ref, w2_ref, b2_ref,              # fused MLP params (resident)
    w3_ref, b3_ref, w4_ref, b4_ref,              # weights (out,in), biases (out,TB)
    z1t_ref,                                     # output (d2, TB)
):
    d2 = z1t_ref.shape[0]
    sp8 = w4_ref.shape[0] // 2                   # sublane-aligned head width

    # Fused 4-layer MLP, batch on lanes: h_{k+1} = leaky(W_k @ h_k + b_k).
    # Biases are pre-broadcast to (out, TB) -> plain full-width adds.
    h = x0t_ref[...]                                                          # (d2,  TB)
    h = _leaky_relu(jnp.dot(w1_ref[...], h, preferred_element_type=jnp.float32) + b1_ref[...])
    h = _leaky_relu(jnp.dot(w2_ref[...], h, preferred_element_type=jnp.float32) + b2_ref[...])
    h = _leaky_relu(jnp.dot(w3_ref[...], h, preferred_element_type=jnp.float32) + b3_ref[...])
    out = jnp.dot(w4_ref[...], h, preferred_element_type=jnp.float32) + b4_ref[...]  # (2*sp8, TB)

    # Tile-aligned heads: rows [0, sp8) = s head (row d2-1 is the folded
    # compensating component, rows >= d2 are zero padding), rows [sp8, 2*sp8)
    # = t head.  Both slices are free views (no sublane relayout).
    s = out[:d2, :]                                                           # (d2, TB)
    t = out[sp8:sp8 + d2, :]                                                  # (d2, TB)

    z1t_ref[...] = jnp.exp(s) * x1t_ref[...] + t
    # log_det == 0 exactly by construction; the wrapper returns zeros, no
    # second output stream / store is emitted from the kernel.


# --------------------------- fused parameter packing -------------------------

def _pack_fused_params(s_params, t_params, d2, nh):
    """Fuse s/t MLPs: concat layer-1 outputs, block-diag layers 2-4.

    Layer 4 additionally
      * folds the compensating last s-component directly into the weights
        (row = -sum of the free-output columns of sw4, bias = -sum(sb4)),
      * zero-pads each head's output to a multiple of 8 rows so the in-kernel
        s/t split is sublane-tile aligned.
    Stored in (out, in) layout for the batch-on-lanes kernel.
    """
    sw1, sb1, sw2, sb2, sw3, sb3, sw4, sb4 = s_params
    tw1, tb1, tw2, tb2, tw3, tb3, tw4, tb4 = t_params

    sp8 = ((d2 + 7) // 8) * 8                     # aligned head width (>= d2)

    # Fold the compensating component (s_final = -sum(s_free)) into layer 4.
    sw4c = jnp.concatenate([sw4, -jnp.sum(sw4, axis=1, keepdims=True)], axis=1)  # (nh, d2)
    sb4c = jnp.concatenate([sb4, -jnp.sum(sb4, axis=1, keepdims=True)], axis=1)  # (1,  d2)

    # Pad each head's output to the aligned width.
    sw4p = jnp.pad(sw4c, ((0, 0), (0, sp8 - d2)))                                # (nh, sp8)
    sb4p = jnp.pad(sb4c, ((0, 0), (0, sp8 - d2)))                                # (1,  sp8)
    tw4p = jnp.pad(tw4, ((0, 0), (0, sp8 - d2)))                                 # (nh, sp8)
    tb4p = jnp.pad(tb4, ((0, 0), (0, sp8 - d2)))                                 # (1,  sp8)

    def blockdiag(a, b):                          # (in, out) convention
        z_ab = jnp.zeros((a.shape[0], b.shape[1]), jnp.float32)
        z_ba = jnp.zeros((b.shape[0], a.shape[1]), jnp.float32)
        return jnp.concatenate(
            [jnp.concatenate([a, z_ab], axis=1),
             jnp.concatenate([z_ba, b], axis=1)], axis=0)

    w1f = jnp.concatenate([sw1, tw1], axis=1).T   # (2nh, d2)
    b1f = jnp.concatenate([sb1, tb1], axis=1).T   # (2nh, 1)
    w2f = blockdiag(sw2, tw2).T                   # (2nh, 2nh)
    b2f = jnp.concatenate([sb2, tb2], axis=1).T
    w3f = blockdiag(sw3, tw3).T
    b3f = jnp.concatenate([sb3, tb3], axis=1).T
    w4f = blockdiag(sw4p, tw4p).T                 # (2*sp8, 2nh)
    b4f = jnp.concatenate([sb4p, tb4p], axis=1).T  # (2*sp8, 1)
    return (w1f, b1f, w2f, b2f, w3f, b3f, w4f, b4f), sp8


# ------------------------------ python wrapper -------------------------------

def _pick_tb(B):
    """Batch tile: as large as possible (per-step overhead dominates this
    tiny body) while keeping >= 2 grid steps so both v7x TensorCores get work.
    Capped at 1024 lanes; VMEM is never the constraint at these shapes."""
    half = -(-B // 2)
    tb = ((half + 127) // 128) * 128
    return int(max(128, min(1024, tb)))


def incompressible_flow_forward(x, s_params, t_params, dim, parity, *, tb=None):
    """Forward pass matching Incompressibleflow.forward. x: (B, dim) float32."""
    d2 = dim // 2
    nh = s_params[0].shape[1]
    B = x.shape[0]

    x0, x1 = x[:, :d2], x[:, d2:]
    if parity:
        x0, x1 = x1, x0

    if tb is None:
        tb = _pick_tb(B)
    n_blocks = pl.cdiv(B, tb)
    bp = n_blocks * tb

    # Lane-dense layout: batch on the 128-lane axis.
    x0t = x0.T                                   # (d2, B)
    x1t = x1.T
    if bp != B:
        x0t = jnp.pad(x0t, ((0, 0), (0, bp - B)))
        x1t = jnp.pad(x1t, ((0, 0), (0, bp - B)))

    fused, sp8 = _pack_fused_params(s_params, t_params, d2, nh)
    # Pre-broadcast biases (odd indices) to full tile width -> resident VMEM
    # inputs; the in-kernel bias add becomes a plain full-width VPU add.
    fused = tuple(
        jnp.broadcast_to(p, (p.shape[0], tb)) if idx % 2 == 1 else p
        for idx, p in enumerate(fused)
    )

    in_specs = [
        pl.BlockSpec((d2, tb), lambda i: (0, i)),          # x0^T batch tile
        pl.BlockSpec((d2, tb), lambda i: (0, i)),          # x1^T batch tile
    ] + [pl.BlockSpec(p.shape, lambda i: (0, 0)) for p in fused]   # params resident

    out_specs = pl.BlockSpec((d2, tb), lambda i: (0, i))   # z1^T (lane-dense)

    # Scheduler hint for XLA around the custom call.
    nh2 = 2 * nh
    flops = 2 * bp * (nh2 * d2 + 2 * nh2 * nh2 + nh2 * 2 * sp8) + 4 * d2 * bp
    weight_bytes = 4 * sum(int(p.size) for p in fused)
    bytes_accessed = 4 * 3 * d2 * bp + weight_bytes
    cost = pl.CostEstimate(flops=int(flops),
                           transcendentals=int(bp * d2),
                           bytes_accessed=int(bytes_accessed))

    z1t = pl.pallas_call(
        _incompressible_flow_kernel,
        out_shape=jax.ShapeDtypeStruct((d2, bp), jnp.float32),
        grid=(n_blocks,),
        in_specs=in_specs,
        out_specs=out_specs,
        compiler_params=pltpu.CompilerParams(
            dimension_semantics=("parallel",)),            # shards across v7x's 2 TCs
        cost_estimate=cost,
    )(x0t, x1t, *fused)

    z1 = z1t[:, :B].T
    # Incompressible flow: log_det is exactly zero by construction.
    log_det = jnp.zeros((B,), jnp.float32)

    z0 = x0
    if parity:
        z0, z1 = z1, z0
    z = jnp.concatenate([z0, z1], axis=1)
    return z, log_det


# ------------------------------ parameter init -------------------------------

def init_mlp_params(key, nin, nout, nh):
    """Deterministic init mimicking torch.nn.Linear default (uniform +-1/sqrt(fan_in))."""
    keys = jax.random.split(key, 8)

    def linear(kw, kb, fin, fout):
        bound = 1.0 / jnp.sqrt(jnp.float32(fin))
        w = jax.random.uniform(kw, (fin, fout), jnp.float32, -bound, bound)
        b = jax.random.uniform(kb, (1, fout), jnp.float32, -bound, bound)
        return w, b

    w1, b1 = linear(keys[0], keys[1], nin, nh)
    w2, b2 = linear(keys[2], keys[3], nh, nh)
    w3, b3 = linear(keys[4], keys[5], nh, nh)
    w4, b4 = linear(keys[6], keys[7], nh, nout)
    return (w1, b1, w2, b2, w3, b3, w4, b4)


# ------------------------------ pure-JAX reference ---------------------------

def _mlp4_ref(h, params):
    w1, b1, w2, b2, w3, b3, w4, b4 = params
    h = _leaky_relu(h @ w1 + b1)
    h = _leaky_relu(h @ w2 + b2)
    h = _leaky_relu(h @ w3 + b3)
    return h @ w4 + b4


def reference_forward(x, s_params, t_params, dim, parity):
    d2 = dim // 2
    x0, x1 = x[:, :d2], x[:, d2:]
    if parity:
        x0, x1 = x1, x0
    s_free = _mlp4_ref(x0, s_params)
    s_final = -jnp.sum(s_free, axis=1, keepdims=True)
    s = jnp.concatenate([s_free, s_final], axis=1)
    t = _mlp4_ref(x0, t_params)
    z0 = x0
    z1 = jnp.exp(s) * x1 + t
    if parity:
        z0, z1 = z1, z0
    z = jnp.concatenate([z0, z1], axis=1)
    log_det = jnp.sum(s, axis=1)
    return z, log_det


# ----------------------------------- main ------------------------------------

if __name__ == "__main__":
    dim = 8        # flow dimension (features)
    nh = 24        # module default hidden width
    B = 256        # batch size -> 2 lane-dense grid steps
    d2 = dim // 2

    key = jax.random.PRNGKey(0)
    k_x, k_s, k_t = jax.random.split(key, 3)

    x = jax.random.normal(k_x, (B, dim), jnp.float32)
    s_params = init_mlp_params(k_s, d2, d2 - 1, nh)   # s_cond: dim//2 -> dim//2 - 1
    t_params = init_mlp_params(k_t, d2, d2, nh)       # t_cond: dim//2 -> dim//2

    for parity in (0, 1):
        z, log_det = incompressible_flow_forward(x, s_params, t_params, dim, parity)
        z = jax.block_until_ready(z)
        log_det = jax.block_until_ready(log_det)

        z_ref, log_det_ref = reference_forward(x, s_params, t_params, dim, parity)

        assert z.shape == (B, dim) and log_det.shape == (B,)
        assert jnp.allclose(z, z_ref, atol=1e-4, rtol=1e-4), f"z mismatch (parity={parity})"
        assert jnp.allclose(log_det, log_det_ref, atol=1e-4), f"log_det mismatch (parity={parity})"
        # incompressible: log_det is exactly zero by construction
        assert jnp.array_equal(log_det, jnp.zeros_like(log_det))

    print("KERNEL_OK")
</pallas_src>

<mosaic_0001>
module attributes {stable_mosaic.version = 11 : i64} {
  func.func @_incompressible_flow_kernel(%arg0: i32, %arg1: memref<4x128xf32, #tpu.memory_space<vmem>>, %arg2: memref<4x128xf32, #tpu.memory_space<vmem>>, %arg3: memref<48x4xf32, #tpu.memory_space<vmem>>, %arg4: memref<48x128xf32, #tpu.memory_space<vmem>>, %arg5: memref<48x48xf32, #tpu.memory_space<vmem>>, %arg6: memref<48x128xf32, #tpu.memory_space<vmem>>, %arg7: memref<48x48xf32, #tpu.memory_space<vmem>>, %arg8: memref<48x128xf32, #tpu.memory_space<vmem>>, %arg9: memref<16x48xf32, #tpu.memory_space<vmem>>, %arg10: memref<16x128xf32, #tpu.memory_space<vmem>>, %arg11: memref<4x128xf32, #tpu.memory_space<vmem>>) attributes {dimension_semantics = [#tpu.dimension_semantics<parallel>], iteration_bounds = array<i64: 2>, scalar_prefetch = 0 : i64, scratch_operands = 0 : i64, tpu.core_type = #tpu.core_type<tc>, window_params = [{transform_indices = @transform_0, window_bounds = array<i64: 4, 128>}, {transform_indices = @transform_1, window_bounds = array<i64: 4, 128>}, {pipeline_mode = #tpu.pipeline_mode<synchronous>, transform_indices = @transform_2, window_bounds = array<i64: 48, 4>}, {pipeline_mode = #tpu.pipeline_mode<synchronous>, transform_indices = @transform_3, window_bounds = array<i64: 48, 128>}, {pipeline_mode = #tpu.pipeline_mode<synchronous>, transform_indices = @transform_4, window_bounds = array<i64: 48, 48>}, {pipeline_mode = #tpu.pipeline_mode<synchronous>, transform_indices = @transform_5, window_bounds = array<i64: 48, 128>}, {pipeline_mode = #tpu.pipeline_mode<synchronous>, transform_indices = @transform_6, window_bounds = array<i64: 48, 48>}, {pipeline_mode = #tpu.pipeline_mode<synchronous>, transform_indices = @transform_7, window_bounds = array<i64: 48, 128>}, {pipeline_mode = #tpu.pipeline_mode<synchronous>, transform_indices = @transform_8, window_bounds = array<i64: 16, 48>}, {pipeline_mode = #tpu.pipeline_mode<synchronous>, transform_indices = @transform_9, window_bounds = array<i64: 16, 128>}, {transform_indices = @transform_10, window_bounds = array<i64: 4, 128>}]} {
    %c0 = arith.constant 0 : index
    %c0_0 = arith.constant 0 : index
    %0 = vector.load %arg1[%c0, %c0_0] : memref<4x128xf32, #tpu.memory_space<vmem>>, vector<4x128xf32>
    %c0_1 = arith.constant 0 : index
    %c0_2 = arith.constant 0 : index
    %1 = vector.load %arg3[%c0_1, %c0_2] : memref<48x4xf32, #tpu.memory_space<vmem>>, vector<48x4xf32>
    %cst = arith.constant dense<0.000000e+00> : vector<48x128xf32>
    %2 = tpu.matmul %1, %0, %cst {dimension_numbers = #tpu.dot_dimension_numbers<[1], [0], [0], [1], [0, 0, 1, 1], [], []>} : vector<48x4xf32>, vector<4x128xf32>, vector<48x128xf32> -> vector<48x128xf32>
    %c0_3 = arith.constant 0 : index
    %c0_4 = arith.constant 0 : index
    %3 = vector.load %arg4[%c0_3, %c0_4] : memref<48x128xf32, #tpu.memory_space<vmem>>, vector<48x128xf32>
    %4 = arith.addf %2, %3 : vector<48x128xf32>
    %cst_5 = arith.constant 0.000000e+00 : f32
    %5 = vector.broadcast %cst_5 : f32 to vector<48x128xf32>
    %6 = arith.cmpf ogt, %4, %5 : vector<48x128xf32>
    %cst_6 = arith.constant 2.000000e-01 : f32
    %7 = vector.broadcast %cst_6 : f32 to vector<48x128xf32>
    %8 = arith.mulf %7, %4 : vector<48x128xf32>
    %9 = arith.select %6, %4, %8 : vector<48x128xi1>, vector<48x128xf32>
    %c0_7 = arith.constant 0 : index
    %c0_8 = arith.constant 0 : index
    %10 = vector.load %arg5[%c0_7, %c0_8] : memref<48x48xf32, #tpu.memory_space<vmem>>, vector<48x48xf32>
    %cst_9 = arith.constant dense<0.000000e+00> : vector<48x128xf32>
    %11 = tpu.matmul %10, %9, %cst_9 {dimension_numbers = #tpu.dot_dimension_numbers<[1], [0], [0], [1], [0, 0, 1, 1], [], []>} : vector<48x48xf32>, vector<48x128xf32>, vector<48x128xf32> -> vector<48x128xf32>
    %c0_10 = arith.constant 0 : index
    %c0_11 = arith.constant 0 : index
    %12 = vector.load %arg6[%c0_10, %c0_11] : memref<48x128xf32, #tpu.memory_space<vmem>>, vector<48x128xf32>
    %13 = arith.addf %11, %12 : vector<48x128xf32>
    %cst_12 = arith.constant 0.000000e+00 : f32
    %14 = vector.broadcast %cst_12 : f32 to vector<48x128xf32>
    %15 = arith.cmpf ogt, %13, %14 : vector<48x128xf32>
    %cst_13 = arith.constant 2.000000e-01 : f32
    %16 = vector.broadcast %cst_13 : f32 to vector<48x128xf32>
    %17 = arith.mulf %16, %13 : vector<48x128xf32>
    %18 = arith.select %15, %13, %17 : vector<48x128xi1>, vector<48x128xf32>
    %c0_14 = arith.constant 0 : index
    %c0_15 = arith.constant 0 : index
    %19 = vector.load %arg7[%c0_14, %c0_15] : memref<48x48xf32, #tpu.memory_space<vmem>>, vector<48x48xf32>
    %cst_16 = arith.constant dense<0.000000e+00> : vector<48x128xf32>
    %20 = tpu.matmul %19, %18, %cst_16 {dimension_numbers = #tpu.dot_dimension_numbers<[1], [0], [0], [1], [0, 0, 1, 1], [], []>} : vector<48x48xf32>, vector<48x128xf32>, vector<48x128xf32> -> vector<48x128xf32>
    %c0_17 = arith.constant 0 : index
    %c0_18 = arith.constant 0 : index
    %21 = vector.load %arg8[%c0_17, %c0_18] : memref<48x128xf32, #tpu.memory_space<vmem>>, vector<48x128xf32>
    %22 = arith.addf %20, %21 : vector<48x128xf32>
    %cst_19 = arith.constant 0.000000e+00 : f32
    %23 = vector.broadcast %cst_19 : f32 to vector<48x128xf32>
    %24 = arith.cmpf ogt, %22, %23 : vector<48x128xf32>
    %cst_20 = arith.constant 2.000000e-01 : f32
    %25 = vector.broadcast %cst_20 : f32 to vector<48x128xf32>
    %26 = arith.mulf %25, %22 : vector<48x128xf32>
    %27 = arith.select %24, %22, %26 : vector<48x128xi1>, vector<48x128xf32>
    %c0_21 = arith.constant 0 : index
    %c0_22 = arith.constant 0 : index
    %28 = vector.load %arg9[%c0_21, %c0_22] : memref<16x48xf32, #tpu.memory_space<vmem>>, vector<16x48xf32>
    %cst_23 = arith.constant dense<0.000000e+00> : vector<16x128xf32>
    %29 = tpu.matmul %28, %27, %cst_23 {dimension_numbers = #tpu.dot_dimension_numbers<[1], [0], [0], [1], [0, 0, 1, 1], [], []>} : vector<16x48xf32>, vector<48x128xf32>, vector<16x128xf32> -> vector<16x128xf32>
    %c0_24 = arith.constant 0 : index
    %c0_25 = arith.constant 0 : index
    %30 = vector.load %arg10[%c0_24, %c0_25] : memref<16x128xf32, #tpu.memory_space<vmem>>, vector<16x128xf32>
    %31 = arith.addf %29, %30 : vector<16x128xf32>
    %32 = vector.extract_strided_slice %31 {offsets = [0, 0], sizes = [4, 128], strides = [1, 1]} : vector<16x128xf32> to vector<4x128xf32>
    %33 = vector.extract_strided_slice %31 {offsets = [8, 0], sizes = [4, 128], strides = [1, 1]} : vector<16x128xf32> to vector<4x128xf32>
    %34 = math.exp %32 : vector<4x128xf32>
    %c0_26 = arith.constant 0 : index
    %c0_27 = arith.constant 0 : index
    %35 = vector.load %arg2[%c0_26, %c0_27] : memref<4x128xf32, #tpu.memory_space<vmem>>, vector<4x128xf32>
    %36 = arith.mulf %34, %35 : vector<4x128xf32>
    %37 = arith.addf %36, %33 : vector<4x128xf32>
    %c0_28 = arith.constant 0 : index
    %c0_29 = arith.constant 0 : index
    %38 = vector.load %arg11[%c0_28, %c0_29] : memref<4x128xf32, #tpu.memory_space<vmem>>, vector<4x128xf32>
    tpu.vector_store %arg11[%c0_28, %c0_29], %37 {strides = array<i32>} : memref<4x128xf32, #tpu.memory_space<vmem>>, vector<4x128xf32>,
    return
  }
  func.func @transform_0(%arg0: i32) -> (i32, i32) {
    %c0_i32 = arith.constant 0 : i32
    %c0_i32_0 = arith.constant 0 : i32
    return %c0_i32, %arg0 : i32, i32
  }
  func.func @transform_1(%arg0: i32) -> (i32, i32) {
    %c0_i32 = arith.constant 0 : i32
    %c0_i32_0 = arith.constant 0 : i32
    return %c0_i32, %arg0 : i32, i32
  }
  func.func @transform_2(%arg0: i32) -> (i32, i32) {
    %c0_i32 = arith.constant 0 : i32
    %c0_i32_0 = arith.constant 0 : i32
    %c0_i32_1 = arith.constant 0 : i32
    return %c0_i32, %c0_i32_0 : i32, i32
  }
  func.func @transform_3(%arg0: i32) -> (i32, i32) {
    %c0_i32 = arith.constant 0 : i32
    %c0_i32_0 = arith.constant 0 : i32
    %c0_i32_1 = arith.constant 0 : i32
    return %c0_i32, %c0_i32_0 : i32, i32
  }
  func.func @transform_4(%arg0: i32) -> (i32, i32) {
    %c0_i32 = arith.constant 0 : i32
    %c0_i32_0 = arith.constant 0 : i32
    %c0_i32_1 = arith.constant 0 : i32
    return %c0_i32, %c0_i32_0 : i32, i32
  }
  func.func @transform_5(%arg0: i32) -> (i32, i32) {
    %c0_i32 = arith.constant 0 : i32
    %c0_i32_0 = arith.constant 0 : i32
    %c0_i32_1 = arith.constant 0 : i32
    return %c0_i32, %c0_i32_0 : i32, i32
  }
  func.func @transform_6(%arg0: i32) -> (i32, i32) {
    %c0_i32 = arith.constant 0 : i32
    %c0_i32_0 = arith.constant 0 : i32
    %c0_i32_1 = arith.constant 0 : i32
    return %c0_i32, %c0_i32_0 : i32, i32
  }
  func.func @transform_7(%arg0: i32) -> (i32, i32) {
    %c0_i32 = arith.constant 0 : i32
    %c0_i32_0 = arith.constant 0 : i32
    %c0_i32_1 = arith.constant 0 : i32
    return %c0_i32, %c0_i32_0 : i32, i32
  }
  func.func @transform_8(%arg0: i32) -> (i32, i32) {
    %c0_i32 = arith.constant 0 : i32
    %c0_i32_0 = arith.constant 0 : i32
    %c0_i32_1 = arith.constant 0 : i32
    return %c0_i32, %c0_i32_0 : i32, i32
  }
  func.func @transform_9(%arg0: i32) -> (i32, i32) {
    %c0_i32 = arith.constant 0 : i32
    %c0_i32_0 = arith.constant 0 : i32
    %c0_i32_1 = arith.constant 0 : i32
    return %c0_i32, %c0_i32_0 : i32, i32
  }
  func.func @transform_10(%arg0: i32) -> (i32, i32) {
    %c0_i32 = arith.constant 0 : i32
    %c0_i32_0 = arith.constant 0 : i32
    return %c0_i32, %arg0 : i32, i32
  }
}

</mosaic_0001>

<bundles_post_ra>
// kernel: tpu_custom_call.1
= control target key start
LH: loop header
LB: loop body
LE: loop exit
PB: predicated region body
PF: predicated region fallthrough
CT: control target
= control target key end

     0   :  { %s1818_s0 = inlined_call_operand.hbm [shape: f32[4,256], index: 0, kind: input, shape index: {}]   ;;  %s1819_s1 = inlined_call_operand.hbm [shape: f32[4,256], index: 1, kind: input, shape index: {}]   ;;  %s1820_s2 = inlined_call_operand.vmem [shape: f32[48,4], index: 2, kind: input, shape index: {}]   ;;  %s1821_s3 = inlined_call_operand.vmem [shape: f32[48,128], index: 3, kind: input, shape index: {}]   ;;  %s1822_s4 = inlined_call_operand.hbm [shape: f32[48,48], index: 4, kind: input, shape index: {}]   ;;  %s1823_s5 = inlined_call_operand.hbm [shape: f32[48,128], index: 5, kind: input, shape index: {}]   ;;  %s1824_s6 = inlined_call_operand.hbm [shape: f32[48,48], index: 6, kind: input, shape index: {}]   ;;  %s1825_s7 = inlined_call_operand.hbm [shape: f32[48,128], index: 7, kind: input, shape index: {}]   ;;  %s1826_s8 = inlined_call_operand.hbm [shape: f32[16,48], index: 8, kind: input, shape index: {}]   ;;  %s1827_s9 = inlined_call_operand.hbm [shape: f32[16,128], index: 9, kind: input, shape index: {}]   ;;  %s1828_s10 = inlined_call_operand.hbm [shape: f32[4,256], index: 10, kind: output, shape index: {}]  }
   0x1   :  { %1832 = sst [smem:[#allocation27_spill]] %s1822_s4 }
   0x2   :  { %1833 = sst [smem:[#allocation28_spill]] %s1823_s5 }
   0x3   :  { %1834 = sst [smem:[#allocation29_spill]] %s1824_s6 }
   0x4   :  { %1835 = sst [smem:[#allocation30_spill]] %s1825_s7 }
   0x5   :  { %1836 = sst [smem:[#allocation31_spill]] %s1826_s8 }
   0x6   :  { %1837 = sst [smem:[#allocation32_spill]] %s1827_s9 }
   0x7   :  { %15 = vsyncpa [#allocation3], 0 }
   0x8   :  { %17 = vsyncpa [#allocation3 + $0x1], 0 }
   0x9   :  { %18 = vsyncpa [#allocation6], 0 }
   0xa   :  { %20 = vsyncpa [#allocation6 + $0x1], 0 }
   0xb   :  { %21 = vsyncpa [#allocation9], 0 }
   0xc   :  { %22 = vsyncpa [#allocation12], 0 }
   0xd   :  { %23 = vsyncpa [#allocation15], 0 }
   0xe   :  { %24 = vsyncpa [#allocation4], 0 }
   0xf   :  { %26 = vsyncpa [#allocation4 + $0x1], 0  ;;  %s1531_s13 = smov 0   ;;  %s1533_s14 = smov 0  }
  0x10   :  { %s1535_s15 = smov 0   ;;  %s1537_s16 = smov 0  }
  0x11 LB: > { %1838 = sst [smem:[#allocation24_spill]] %s1462_s15  ;;  %s1555_s20 = sadd.s32 4294967295, %s1466_s16   ;;  %s1466_s16 = sphi %s1537_s16, %s1855_s16   ;;  %s1462_s15 = sphi %s1535_s15, %s1857_s15   ;;  %s1458_s14 = sphi %s1533_s14, %s1859_s14   ;;  %s1454_s13 = sphi %s1531_s13, %s1858_s13  }
  0x12   : > { %s1839_s4 = sld [smem:[#allocation27_spill]]  ;;  %p977_p0 = scmp.ge.s32.totalorder %s1466_s16, 1 }
  0x13   : > { %p53_p1 = scmp.eq.s32.totalorder %s1555_s20, 0  ;;  %p283_p2 = scmp.lt.s32.totalorder %s1466_s16, 3 }
  0x14   : > { %s1468_s22 = smov [#allocation7]   ;;  %s1841_s5 = sld [smem:[#allocation28_spill]] }
  0x15   : > { %p1560_p3 = pnand %p977_p0, %p283_p2  ;;  %s302_s23 = sshll.u32 %s1468_s22, 4  ;;  %s303_s23 = int_to_ptr.vmem [resolvable:$true] %s302_s23 }
  0x16   : > { %s1843_s7 = sld [smem:[#allocation30_spill]]  ;;  %s1469_s11 = smov [#allocation8]  }
  0x17   : > { %p1054_p4 = pneg %p1560_p3  ;;  %s316_s12 = sshll.u32 %s1469_s11, 4  ;;  %s317_s12 = int_to_ptr.vmem [resolvable:$true] %s316_s12 }
  0x18   : > { %s300_s19 = sshll.u32 %s1839_s4, 4  ;;  %s1470_s17 = smov 128   ;;  %s301_s19 = int_to_ptr.hbm [resolvable:$true] %s300_s19 }
  0x19   : > { %p1572_p6 = pnand %p1054_p4, %p53_p1  ;;  %s1471_s18 = smov 8  }
  0x1a   : > { %s314_s26 = sshll.u32 %s1841_s5, 4  ;;  %s1844_s6 = sld [smem:[#allocation29_spill]]  ;;  %s315_s26 = int_to_ptr.hbm [resolvable:$true] %s314_s26 }
  0x1b   : > { %1057 = dma.hbm_to_vmem [thread:$0]  (!%p1572_p6), %s301_s19, 768, %s303_s23, [#allocation6], %s1470_s17, %s1470_s17, %s1471_s18  }
  0x1c   : > { %s342_s30 = sshll.u32 %s1843_s7, 4  ;;  %s1472_s28 = smov [#allocation11]   ;;  %s343_s30 = int_to_ptr.hbm [resolvable:$true] %s342_s30 }
  0x1d   : > { %1060 = dma.hbm_to_vmem [thread:$0]  (!%p1572_p6), %s315_s26, 768, %s317_s12, [#allocation9], %s1470_s17, %s1470_s17, %s1471_s18  }
  0x1e   : > { %s344_s29 = sshll.u32 %s1472_s28, 4  ;;  %s1473_s19 = smov [#allocation10]   ;;  %s345_s29 = int_to_ptr.vmem [resolvable:$true] %s344_s29 }
  0x1f   : > { %1066 = dma.hbm_to_vmem [thread:$0]  (!%p1572_p6), %s343_s30, 768, %s345_s29, [#allocation12], %s1470_s17, %s1470_s17, %s1471_s18  }
  0x20   : > { %s328_s25 = sshll.u32 %s1844_s6, 4  ;;  %s330_s23 = sshll.u32 %s1473_s19, 4  ;;  %s329_s25 = int_to_ptr.hbm [resolvable:$true] %s328_s25  ;;  %s331_s23 = int_to_ptr.vmem [resolvable:$true] %s330_s23 }
  0x21   : > { %s1845_s8 = sld [smem:[#allocation31_spill]]  ;;  %s1474_s28 = smov [#allocation13]  }
  0x22   : > { %1063 = dma.hbm_to_vmem [thread:$0]  (!%p1572_p6), %s329_s25, 768, %s331_s23, [#allocation9], %s1470_s17, %s1470_s17, %s1471_s18  }
  0x23   : > { %s1846_s9 = sld [smem:[#allocation32_spill]]  ;;  %s358_s29 = sshll.u32 %s1474_s28, 4  ;;  %s359_s29 = int_to_ptr.vmem [resolvable:$true] %s358_s29 }
  0x24   : > { %s1475_s25 = smov [#allocation14]   ;;  %s976_s23 = sadd.s32 4294967294, %s1466_s16  }
  0x25   : > { %s372_s19 = sshll.u32 %s1475_s25, 4  ;;  %s1620_s11 = sadd.s32 1, %s1466_s16   ;;  %s373_s19 = int_to_ptr.vmem [resolvable:$true] %s372_s19 }
  0x26   : > { %1847 = sst [smem:[#allocation25_spill]] %s1620_s11  ;;  %s36_s26 = ssub.s32 %s1466_s16, %s1620_s11 }
  0x27   : > { %s356_s12 = sshll.u32 %s1845_s8, 4  ;;  %s39_s22 = sadd.s32 1, %s1462_s15  ;;  %s357_s12 = int_to_ptr.hbm [resolvable:$true] %s356_s12 }
  0x28   : > { %1069 = dma.hbm_to_vmem [thread:$0]  (!%p1572_p6), %s357_s12, 256, %s359_s29, [#allocation12], %s1470_s17, %s1470_s17, %s1471_s18  }
  0x29   : > { %s370_s24 = sshll.u32 %s1846_s9, 4  ;;  %p37_p7 = scmp.eq.s32.totalorder %s36_s26, 0  ;;  %s371_s24 = int_to_ptr.hbm [resolvable:$true] %s370_s24 }
  0x2a   : > { %1072 = dma.hbm_to_vmem [thread:$0]  (!%p1572_p6), %s371_s24, 256, %s373_s19, [#allocation15], %s1470_s17, %s1470_s17, %s1471_s18  }
  0x2b   : > { %p46_p8 = scmp.ne.s32.totalorder %s1462_s15, %s1458_s14  ;;  %p47_p9 = scmp.eq.s32.totalorder %s1466_s16, 0 }
  0x2c   : > { %p52_p10 = scmp.ne.s32.totalorder %s1458_s14, %s1454_s13  ;;  %p270_p13 = scmp.eq.s32.totalorder %s1555_s20, 1 }
  0x2d   : > { %s1631_s12 = scalar_select %p37_p7, %s1462_s15, %s39_s22  }
  0x2e   : > { %p1633_p11 = por %p47_p9, %p46_p8  ;;  %p1639_p12 = por %p53_p1, %p52_p10 }
  0x2f   : > { %1848 = sst [smem:[#allocation26_spill]] %s1631_s12  ;;  %p276_p0 = scmp.eq.s32.totalorder %s976_s23, 1 }
  0x30   : > { %p1090_p2 = scmp.lt.s32.totalorder %s1466_s16, 2  ;;  %s386_s18 = sand.u32 1, %s1462_s15  }
  0x31   : > { %p1646_p4 = por %p270_p13, %p46_p8  ;;  %p1650_p6 = por %p276_p0, %p52_p10 }
  0x32   : > { %s1654_s28 = sshll.u32 %s386_s18, 2  ;;  %s986_s29 = sshll.u32 %s1466_s16, 2 }
  0x33   : > { %s394_s26 = scalar_lea.hbm %s1818_s0, %s986_s29  ;;  %s390_s22 = scalar_lea.vmem [#allocation2], %s1654_s28 }
  0x34   : > { %s398_s23 = sshll.u32 %s390_s22, 4  ;;  %s396_s4 = sshll.u32 %s394_s26, 4  ;;  %s399_s23 = int_to_ptr.vmem [resolvable:$true] %s398_s23  ;;  %s397_s4 = int_to_ptr.hbm [resolvable:$true] %s396_s4 }
  0x35   : > { %p1663_p7 = pnand %p1090_p2, %p1633_p11  ;;  %s413_s8 = scalar_lea.hbm %s1819_s1, %s986_s29 }
  0x36   : > { %s405_s9 = sand.u32 1, %s1466_s16   ;;  %s387_s12 = scalar_lea.sflag [#allocation3], %s386_s18 }
  0x37   : > { %s1320_s25 = sshra.s32 %s397_s4, 4  ;;  %p1324_p9 = pneg %p1663_p7  ;;  %s1321_s25 = int_to_ptr.hbm [resolvable:$true] %s1320_s25 }
  0x38   : > { %s1322_s19 = scalar_lea.hbm %s1321_s25, 4  ;;  %s1327_s22 = scalar_lea.hbm %s1818_s0, 8 }
  0x39   : > { %p1323_p8 = scmp.ne.s32.totalorder %s1321_s25, %s1322_s19  ;;  %p1328_p13 = scmp.lt.s32.totalorder %s1321_s25, %s1818_s0 }
  0x3a   : > { %p1329_p0 = scmp.lt.s32.totalorder %s1327_s22, %s1322_s19 }
  0x3b   : > { %p1325_p10 = pnand %p1324_p9, %p1323_p8 }
  0x3c   : > { %p1330_p2 = por %p1329_p0, %p1328_p13 }
  0x3d   : > { %p1326_p11 = pneg %p1325_p10 }
  0x3f   : > { %p1331_p5 = pnand %p1330_p2, %p1326_p11 }
  0x41   : > { %1334 = shalt.err (!%p1331_p5)
}
  0x42   : > { %1076 = dma.hbm_to_vmem [thread:$0]  (!%p1663_p7), %s397_s4, 64, %s399_s23, %s387_s12  }
  0x43   : > { %s415_s18 = sshll.u32 %s413_s8, 4  ;;  %s409_s29 = scalar_lea.vmem [#allocation5], %s1654_s28  ;;  %s416_s18 = int_to_ptr.hbm [resolvable:$true] %s415_s18 }
  0x44   : > { %s417_s15 = sshll.u32 %s409_s29, 4  ;;  %s406_s27 = scalar_lea.sflag [#allocation6], %s405_s9  ;;  %s418_s15 = int_to_ptr.vmem [resolvable:$true] %s417_s15 }
  0x45   : > { %s1350_s26 = sshra.s32 %s416_s18, 4  ;;  %s1357_s22 = scalar_lea.hbm %s1819_s1, 8  ;;  %s1351_s26 = int_to_ptr.hbm [resolvable:$true] %s1350_s26 }
  0x46   : > { %s1352_s11 = scalar_lea.hbm %s1351_s26, 4  ;;  %p1358_p5 = scmp.lt.s32.totalorder %s1351_s26, %s1819_s1 }
  0x47   : > { %p1353_p8 = scmp.ne.s32.totalorder %s1351_s26, %s1352_s11  ;;  %p1359_p13 = scmp.lt.s32.totalorder %s1357_s22, %s1352_s11 }
  0x49   : > { %p1355_p10 = pnand %p1353_p8, %p1324_p9  ;;  %p1360_p0 = por %p1359_p13, %p1358_p5 }
  0x4b   : > { %p1356_p11 = pneg %p1355_p10 }
  0x4d   : > { %p1361_p2 = pnand %p1360_p0, %p1356_p11 }
  0x4f   : > { %1364 = shalt.err (!%p1361_p2)
}
  0x50   : > { %1079 = dma.hbm_to_vmem [thread:$0]  (!%p1663_p7), %s416_s18, 64, %s418_s15, %s406_s27  }
  0x51   : > { %426 = sbr.rel (%p1560_p3) target bundleno = 802 (0x322), region = 60  ;;  %s1699_s8 = sand.u32 (!%p1560_p3), 1, %s1458_s14  }
  0x52   : > { %s1702_s9 = sshll.u32 (!%p1560_p3), %s1699_s8, 2  ;;  %s429_s12 = scalar_lea.sflag (!%p1560_p3), [#allocation3], %s1699_s8 }
  0x53   : > { %s432_s11 = scalar_lea.vmem (!%p1560_p3), [#allocation2], %s1702_s9 }
  0x56   : > { %1425 = dma.done.wait (%p1639_p12), %s429_s12, 64  }
  0x57   : > { %1427 = vsyncadd (%p1639_p12), %s429_s12, 4294967232  ;;  %s438_s5 = sand.u32 1, %s1555_s20   ;;  %s442_s21 = scalar_lea.vmem [#allocation5], %s1702_s9 }
  0x58   : > { %s439_s15 = scalar_lea.sflag [#allocation6], %s438_s5 }
  0x59   : > { %1429 = dma.done.wait (%p1639_p12), %s439_s15, 64  }
  0x5a   : > { %1431 = vsyncadd (%p1639_p12), %s439_s15, 4294967232 }
  0x5b   : > { %1433 = dma.done.wait (%p53_p1), [#allocation6], 768  }
  0x5c   : > { %1435 = vsyncadd (%p53_p1), [#allocation6], 4294966528 }
  0x5d   : > { %1437 = dma.done.wait (%p53_p1), [#allocation9], 1536  }
  0x5e   : > { %1439 = vsyncadd (%p53_p1), [#allocation9], 4294965760 }
  0x5f   : > { %1441 = dma.done.wait (%p53_p1), [#allocation12], 1024  }
  0x60   : > { %1443 = vsyncadd (%p53_p1), [#allocation12], 4294966272 }
  0x61   : > { %1445 = dma.done.wait (%p53_p1), [#allocation15], 256  }
  0x62   : > { %1447 = vsyncadd (%p53_p1), [#allocation15], 4294967040  ;;  %vm547_vm0 = vcmask 1043456   ;;  %vm528_vm1 = vcmask 31744   ;;  %v515_v0 = vld [vmem:[%s432_s11] sm:$0xf] }
  0x63   : > { %v516_v1 = vld [vmem:[%s1820_s2] sm:$0xff]  ;;  %999 = vmatpush.msk.msra.mxu0 %vm547_vm0, %v515_v0  ;;  %v517_v2 = vld [vmem:[%s1820_s2 + $0x8] sm:$0xff]  ;;  %v518_v3 = vld [vmem:[%s1820_s2 + $0x10] sm:$0xff]  ;;  %vm616_vm8 = vcmask 392192   ;;  %s1021_s26 = sshll.u32 %s1555_s20, 2  ;;  %s514_s6 = scalar_lea.vmem [#allocation16], %s1702_s9 }
  0x64   : > { %1000 = vmatmul.msk.f32.vlgmr.msra.gmra.mxu0 %vm528_vm1, %v516_v1  ;;  %v519_v4 = vld [vmem:[%s1820_s2 + $0x18] sm:$0xff]  ;;  %v520_v5 = vld [vmem:[%s1820_s2 + $0x20] sm:$0xff]  ;;  %v521_v6 = vld [vmem:[%s1820_s2 + $0x28] sm:$0xff]  ;;  %s821_s22 = scalar_lea.hbm %s1828_s10, %s1021_s26  ;;  %s823_s4 = sshll.u32 %s514_s6, 4  ;;  %s824_s4 = int_to_ptr.vmem [resolvable:$true] %s823_s4 }
  0x65   : > { %v526_v12 = vld [vmem:[%s1821_s3 + $0x20] sm:$0xff]  ;;  %v525_v13 = vld [vmem:[%s1821_s3 + $0x18] sm:$0xff]  ;;  %v527_v14 = vld [vmem:[%s1821_s3 + $0x28] sm:$0xff]  ;;  %s825_s12 = sshll.u32 %s821_s22, 4  ;;  %s811_s20 = scalar_lea.sflag [#allocation4], %s1699_s8  ;;  %s826_s12 = int_to_ptr.hbm [resolvable:$true] %s825_s12 }
  0x66   : > { %v524_v16 = vld [vmem:[%s1821_s3 + $0x10] sm:$0xff]  ;;  %v523_v20 = vld [vmem:[%s1821_s3 + $0x8] sm:$0xff]  ;;  %v522_v24 = vld [vmem:[%s1821_s3] sm:$0xff]  ;;  %s1394_s11 = sshra.s32 %s826_s12, 4  ;;  %s1400_s17 = scalar_lea.hbm %s1828_s10, 8  ;;  %s1395_s11 = int_to_ptr.hbm [resolvable:$true] %s1394_s11 }
  0x67   : > { %v604_v36 = vld [vmem:[#allocation7] sm:$0xff]  ;;  %v605_v38 = vld [vmem:[#allocation7 + $0x8] sm:$0xff]  ;;  %v606_v39 = vld [vmem:[#allocation7 + $0x10] sm:$0xff]  ;;  %s1396_s5 = scalar_lea.hbm %s1395_s11, 4  ;;  %p1401_p7 = scmp.lt.s32.totalorder %s1395_s11, %s1828_s10 }
  0x68   : > { %v607_v40 = vld [vmem:[#allocation7 + $0x18] sm:$0xff]  ;;  %v608_v41 = vld [vmem:[#allocation7 + $0x20] sm:$0xff]  ;;  %v609_v42 = vld [vmem:[#allocation7 + $0x28] sm:$0xff]  ;;  %p1397_p1 = scmp.ne.s32.totalorder %s1395_s11, %s1396_s5  ;;  %p1402_p9 = scmp.lt.s32.totalorder %s1400_s17, %s1396_s5 }
  0x69   : > { %v614_v48 = vld [vmem:[#allocation8 + $0x20] sm:$0xff]  ;;  %v613_v49 = vld [vmem:[#allocation8 + $0x18] sm:$0xff]  ;;  %v615_v50 = vld [vmem:[#allocation8 + $0x28] sm:$0xff] }
  0x6a   : > { %v612_v52 = vld [vmem:[#allocation8 + $0x10] sm:$0xff]  ;;  %v611_v56 = vld [vmem:[#allocation8 + $0x8] sm:$0xff]  ;;  %v610_v60 = vld [vmem:[#allocation8] sm:$0xff]  ;;  %p1398_p3 = pnand %p1397_p1, %p1646_p4  ;;  %p1403_p8 = por %p1402_p9, %p1401_p7 }
  0x6c   : > { %1001 = vmatmul.msk.f32.gmra.mxu0 %vm528_vm1, %v517_v2  ;;  %p1399_p12 = pneg %p1398_p3 }
  0x6e   : > { %p1404_p10 = pnand %p1403_p8, %p1399_p12 }
  0x74   : > { %1002 = vmatmul.msk.f32.gmra.mxu0 %vm528_vm1, %v518_v3 }
  0x7c   : > { %1003 = vmatmul.msk.f32.gmra.mxu0 %vm528_vm1, %v519_v4 }
  0x84   : > { %1004 = vmatmul.msk.f32.gmra.mxu0 %vm528_vm1, %v520_v5 }
  0x8c   : > { %1005 = vmatmul.msk.f32.gmra.mxu0 %vm528_vm1, %v521_v6 }
  0xe1   : > { %v568_v7 = vpop.f32.mrf.mxu0 }
  0xe2   : > { %v569_v28 = vadd.f32 %v568_v7, %v522_v24  ;;  %v696_v24 = vld [vmem:[#allocation11 + $0x10] sm:$0xff] }
  0xe4   : > { %v592_v34 = vmul.f32 0.2, %v569_v28  ;;  %vm586_vm7 = vcmp.gt.f32.partialorder %v569_v28, 0.0 }
  0xe6   : > { %v598_v37 = vsel %vm586_vm7, %v569_v28, %v592_v34  ;;  %v695_v28 = vld [vmem:[#allocation11 + $0x8] sm:$0xff] }
  0xe9   : > { %v571_v8 = vpop.f32.mrf.mxu0 }
  0xea   : > { %v572_v25 = vadd.f32 %v571_v8, %v523_v20  ;;  %v688_v8 = vld [vmem:[#allocation10] sm:$0xff]  ;;  %v698_v20 = vld [vmem:[#allocation11 + $0x20] sm:$0xff] }
  0xec   : > { %v593_v32 = vmul.f32 0.2, %v572_v25  ;;  %vm587_vm6 = vcmp.gt.f32.partialorder %v572_v25, 0.0 }
  0xee   : > { %v599_v35 = vsel %vm587_vm6, %v572_v25, %v593_v32  ;;  %v694_v32 = vld [vmem:[#allocation11] sm:$0xff] }
  0xf1   : > { %v574_v9 = vpop.f32.mrf.mxu0 }
  0xf2   : > { %v575_v21 = vadd.f32 %v574_v9, %v524_v16 }
  0xf4   : > { %v594_v30 = vmul.f32 0.2, %v575_v21  ;;  %vm588_vm5 = vcmp.gt.f32.partialorder %v575_v21, 0.0 }
  0xf6   : > { %v600_v33 = vsel %vm588_vm5, %v575_v21, %v594_v30  ;;  %v697_v21 = vld [vmem:[#allocation11 + $0x18] sm:$0xff] }
  0xf9   : > { %v577_v10 = vpop.f32.mrf.mxu0 }
  0xfa   : > { %v578_v18 = vadd.f32 %v577_v10, %v525_v13  ;;  %v689_v10 = vld [vmem:[#allocation10 + $0x8] sm:$0xff]  ;;  %v692_v13 = vld [vmem:[#allocation10 + $0x20] sm:$0xff] }
  0xfc   : > { %v595_v27 = vmul.f32 0.2, %v578_v18  ;;  %vm589_vm4 = vcmp.gt.f32.partialorder %v578_v18, 0.0 }
  0xfe   : > { %v601_v31 = vsel %vm589_vm4, %v578_v18, %v595_v27 }
 0x101   : > { %v580_v11 = vpop.f32.mrf.mxu0 }
 0x102   : > { %v581_v15 = vadd.f32 %v580_v11, %v526_v12  ;;  %v690_v11 = vld [vmem:[#allocation10 + $0x10] sm:$0xff]  ;;  %v691_v12 = vld [vmem:[#allocation10 + $0x18] sm:$0xff] }
 0x104   : > { %v596_v23 = vmul.f32 0.2, %v581_v15  ;;  %vm590_vm3 = vcmp.gt.f32.partialorder %v581_v15, 0.0 }
 0x106   : > { %v602_v29 = vsel %vm590_vm3, %v581_v15, %v596_v23 }
 0x109   : > { %v583_v17 = vpop.f32.mrf.mxu0 }
 0x10a   : > { %v584_v19 = vadd.f32 %v583_v17, %v527_v14  ;;  %v693_v14 = vld [vmem:[#allocation10 + $0x28] sm:$0xff] }
 0x10c   : > { %vm591_vm2 = vcmp.gt.f32.partialorder %v584_v19, 0.0  ;;  %v597_v22 = vmul.f32 0.2, %v584_v19 }
 0x10e   : > { %v603_v26 = vsel %vm591_vm2, %v584_v19, %v597_v22  ;;  %v699_v22 = vld [vmem:[#allocation11 + $0x28] sm:$0xff] }
 0x10f   : > { %645 = vmatpush.msra.mxu1 %v603_v26 }
 0x111   : > { %646 = vmatpush.msra.mxu1 %v602_v29 }
 0x113   : > { %647 = vmatpush.msra.mxu1 %v601_v31 }
 0x115   : > { %648 = vmatpush.msra.mxu1 %v600_v33 }
 0x117   : > { %649 = vmatpush.msra.mxu1 %v599_v35 }
 0x119   : > { %650 = vmatpush.msra.mxu1 %v598_v37 }
 0x11a   : > { %1006 = vmatmul.msk.f32.vlgmr.msra.gmra.mxu1 %vm616_vm8, %v604_v36 }
 0x122   : > { %1007 = vmatmul.msk.f32.gmra.mxu1 %vm616_vm8, %v605_v38 }
 0x12a   : > { %1008 = vmatmul.msk.f32.gmra.mxu1 %vm616_vm8, %v606_v39 }
 0x132   : > { %1009 = vmatmul.msk.f32.gmra.mxu1 %vm616_vm8, %v607_v40 }
 0x13a   : > { %1010 = vmatmul.msk.f32.gmra.mxu1 %vm616_vm8, %v608_v41 }
 0x142   : > { %1011 = vmatmul.msk.f32.gmra.mxu1 %vm616_vm8, %v609_v42 }
 0x197   : > { %v652_v43 = vpop.f32.mrf.mxu1 }
 0x198   : > { %v653_v0 = vadd.f32 %v652_v43, %v610_v60 }
 0x19a   : > { %v676_v6 = vmul.f32 0.2, %v653_v0  ;;  %vm670_vm14 = vcmp.gt.f32.partialorder %v653_v0, 0.0 }
 0x19c   : > { %v682_v9 = vsel %vm670_vm14, %v653_v0, %v676_v6 }
 0x19f   : > { %v655_v44 = vpop.f32.mrf.mxu1 }
 0x1a0   : > { %v656_v61 = vadd.f32 %v655_v44, %v611_v56  ;;  %v771_v44 = vld [vmem:[#allocation13] sm:$0xff] }
 0x1a2   : > { %v677_v4 = vmul.f32 0.2, %v656_v61  ;;  %vm671_vm13 = vcmp.gt.f32.partialorder %v656_v61, 0.0 }
 0x1a4   : > { %v683_v7 = vsel %vm671_vm13, %v656_v61, %v677_v4 }
 0x1a7   : > { %v658_v45 = vpop.f32.mrf.mxu1 }
 0x1a8   : > { %v659_v57 = vadd.f32 %v658_v45, %v612_v52 }
 0x1aa   : > { %v678_v2 = vmul.f32 0.2, %v659_v57  ;;  %vm672_vm12 = vcmp.gt.f32.partialorder %v659_v57, 0.0 }
 0x1ac   : > { %v684_v5 = vsel %vm672_vm12, %v659_v57, %v678_v2 }
 0x1af   : > { %v661_v46 = vpop.f32.mrf.mxu1 }
 0x1b0   : > { %v662_v54 = vadd.f32 %v661_v46, %v613_v49  ;;  %v772_v46 = vld [vmem:[#allocation13 + $0x8] sm:$0xff] }
 0x1b2   : > { %v679_v63 = vmul.f32 0.2, %v662_v54  ;;  %vm673_vm11 = vcmp.gt.f32.partialorder %v662_v54, 0.0 }
 0x1b4   : > { %v685_v3 = vsel %vm673_vm11, %v662_v54, %v679_v63 }
 0x1b7   : > { %v664_v47 = vpop.f32.mrf.mxu1 }
 0x1b8   : > { %v665_v51 = vadd.f32 %v664_v47, %v614_v48  ;;  %v773_v47 = vld [vmem:[#allocation14] sm:$0xff] }
 0x1ba   : > { %v680_v59 = vmul.f32 0.2, %v665_v51  ;;  %vm674_vm10 = vcmp.gt.f32.partialorder %v665_v51, 0.0 }
 0x1bc   : > { %v686_v1 = vsel %vm674_vm10, %v665_v51, %v680_v59  ;;  %v774_v51 = vld [vmem:[#allocation14 + $0x8] sm:$0xff] }
 0x1bf   : > { %v667_v53 = vpop.f32.mrf.mxu1 }
 0x1c0   : > { %v668_v55 = vadd.f32 %v667_v53, %v615_v50  ;;  %v806_v53 = vld [vmem:[%s442_s21] sm:$0xf] }
 0x1c2   : > { %vm675_vm9 = vcmp.gt.f32.partialorder %v668_v55, 0.0  ;;  %v681_v58 = vmul.f32 0.2, %v668_v55 }
 0x1c4   : > { %v687_v62 = vsel %vm675_vm9, %v668_v55, %v681_v58 }
 0x1c5   : > { %728 = vmatpush.msra.mxu2 %v687_v62 }
 0x1c7   : > { %729 = vmatpush.msra.mxu2 %v686_v1 }
 0x1c9   : > { %730 = vmatpush.msra.mxu2 %v685_v3 }
 0x1cb   : > { %731 = vmatpush.msra.mxu2 %v684_v5 }
 0x1cd   : > { %732 = vmatpush.msra.mxu2 %v683_v7 }
 0x1cf   : > { %733 = vmatpush.msra.mxu2 %v682_v9 }
 0x1d0   : > { %1012 = vmatmul.msk.f32.vlgmr.msra.gmra.mxu2 %vm616_vm8, %v688_v8 }
 0x1d8   : > { %1013 = vmatmul.msk.f32.gmra.mxu2 %vm616_vm8, %v689_v10 }
 0x1e0   : > { %1014 = vmatmul.msk.f32.gmra.mxu2 %vm616_vm8, %v690_v11 }
 0x1e8   : > { %1015 = vmatmul.msk.f32.gmra.mxu2 %vm616_vm8, %v691_v12 }
 0x1f0   : > { %1016 = vmatmul.msk.f32.gmra.mxu2 %vm616_vm8, %v692_v13 }
 0x1f8   : > { %1017 = vmatmul.msk.f32.gmra.mxu2 %vm616_vm8, %v693_v14 }
 0x253   : > { %v735_v15 = vpop.f32.mrf.mxu2 }
 0x254   : > { %v736_v36 = vadd.f32 %v735_v15, %v694_v32 }
 0x256   : > { %v759_v42 = vmul.f32 0.2, %v736_v36  ;;  %vm753_vm4 = vcmp.gt.f32.partialorder %v736_v36, 0.0 }
 0x258   : > { %v765_v45 = vsel %vm753_vm4, %v736_v36, %v759_v42 }
 0x25b   : > { %v738_v16 = vpop.f32.mrf.mxu2 }
 0x25c   : > { %v739_v33 = vadd.f32 %v738_v16, %v695_v28 }
 0x25e   : > { %v760_v40 = vmul.f32 0.2, %v739_v33  ;;  %vm754_vm3 = vcmp.gt.f32.partialorder %v739_v33, 0.0 }
 0x260   : > { %v766_v43 = vsel %vm754_vm3, %v739_v33, %v760_v40 }
 0x263   : > { %v741_v17 = vpop.f32.mrf.mxu2 }
 0x264   : > { %v742_v29 = vadd.f32 %v741_v17, %v696_v24 }
 0x266   : > { %v761_v38 = vmul.f32 0.2, %v742_v29  ;;  %vm755_vm2 = vcmp.gt.f32.partialorder %v742_v29, 0.0 }
 0x268   : > { %v767_v41 = vsel %vm755_vm2, %v742_v29, %v761_v38 }
 0x26b   : > { %v744_v18 = vpop.f32.mrf.mxu2 }
 0x26c   : > { %v745_v26 = vadd.f32 %v744_v18, %v697_v21 }
 0x26e   : > { %v762_v35 = vmul.f32 0.2, %v745_v26  ;;  %vm756_vm1 = vcmp.gt.f32.partialorder %v745_v26, 0.0 }
 0x270   : > { %v768_v39 = vsel %vm756_vm1, %v745_v26, %v762_v35 }
 0x273   : > { %v747_v19 = vpop.f32.mrf.mxu2 }
 0x274   : > { %v748_v23 = vadd.f32 %v747_v19, %v698_v20 }
 0x276   : > { %v763_v31 = vmul.f32 0.2, %v748_v23  ;;  %vm757_vm0 = vcmp.gt.f32.partialorder %v748_v23, 0.0 }
 0x278   : > { %v769_v37 = vsel %vm757_vm0, %v748_v23, %v763_v31 }
 0x27b   : > { %v750_v25 = vpop.f32.mrf.mxu2 }
 0x27c   : > { %v751_v27 = vadd.f32 %v750_v25, %v699_v22 }
 0x27e   : > { %vm758_vm15 = vcmp.gt.f32.partialorder %v751_v27, 0.0  ;;  %v764_v30 = vmul.f32 0.2, %v751_v27 }
 0x280   : > { %v770_v34 = vsel %vm758_vm15, %v751_v27, %v764_v30 }
 0x281   : > { %791 = vmatpush.msra.mxu3 %v770_v34 }
 0x283   : > { %792 = vmatpush.msra.mxu3 %v769_v37 }
 0x285   : > { %793 = vmatpush.msra.mxu3 %v768_v39 }
 0x287   : > { %794 = vmatpush.msra.mxu3 %v767_v41 }
 0x289   : > { %795 = vmatpush.msra.mxu3 %v766_v43 }
 0x28b   : > { %796 = vmatpush.msra.mxu3 %v765_v45 }
 0x28c   : > { %1018 = vmatmul.msk.f32.vlgmr.msra.gmra.mxu3 %vm616_vm8, %v771_v44 }
 0x294   : > { %1019 = vmatmul.msk.f32.gmra.mxu3 %vm616_vm8, %v772_v46 }
 0x30f   : > { %v798_v48 = vpop.f32.mrf.mxu3 }
 0x310   : > { %v799_v49 = vadd.f32 %v798_v48, %v773_v47 }
 0x312   : > { %v804_v50 = vmul.f32 1.442695, %v799_v49 }
 0x314   : > { %1138 = vpow2.f32 %v804_v50 }
 0x317   : > { %v801_v52 = vpop.f32.mrf.mxu3 }
 0x318   : > { %v802_v54 = vadd.f32 %v801_v52, %v774_v51 }
 0x31a   : > { %v1139_v55 = vpop.eup %1138 }
 0x31b   : > { %v807_v56 = vmul.f32 %v1139_v55, %v806_v53 }
 0x31d   : > { %v808_v57 = vadd.f32 %v807_v56, %v802_v54 }
 0x31f   : > { %809 = vst [vmem:[%s514_s6] sm:$0xf] %v808_v57 }
 0x320   : > { %1407 = shalt.err (!%p1404_p10)
}
 0x321   : > { %1052 = dma.vmem_to_hbm [thread:$0]  (%p1646_p4), %s824_s4, 64, %s826_s12, %s811_s20  }
 0x322 PF: > { %s837_s8 = sand.u32 1, %s1454_s13   ;;  %p1854_p11 = scmp.ge.s32.totalorder %s1466_s16, 2 }
 0x323   : > { %s838_s23 = scalar_lea.sflag [#allocation4], %s837_s8 }
 0x324   : > { %p1081_p5 = pnand %p1854_p11, %p1650_p6 }
 0x326   : > { %p1082_p13 = pneg %p1081_p5 }
 0x328   : > { %1449 = dma.done.wait (%p1082_p13), %s838_s23, 64  }
 0x329   : > { %1451 = vsyncadd (%p1082_p13), %s838_s23, 4294967232  ;;  %s1855_s16 = sld [smem:[#allocation25_spill]]  ;;  %s1858_s13 = smov %s1458_s14 }
 0x32a   : > { %s1856_s7 = sld [smem:[#allocation24_spill]] }
 0x32b   : > { %s1857_s15 = sld [smem:[#allocation26_spill]] }
 0x32f   : > { %p29_p0 = scmp.ge.s32.totalorder %s1855_s16, 4  }
 0x330   : > { %s1859_s14 = smov %s1856_s7 }
 0x331   :  { %31 = sbr.rel (!%p29_p0) target bundleno = 17 (0x11), region = 142 }
 0x336   :  { %844 = vsyncpa [#allocation3], 1 }
 0x337   :  { %846 = vsyncpa [#allocation3 + $0x1], 1 }
 0x338   :  { %847 = vsyncpa [#allocation6], 1 }
 0x339   :  { %849 = vsyncpa [#allocation6 + $0x1], 1 }
 0x33a   :  { %850 = vsyncpa [#allocation9], 1 }
 0x33b   :  { %851 = vsyncpa [#allocation12], 1 }
 0x33c   :  { %852 = vsyncpa [#allocation15], 1 }
 0x33d   :  { %853 = vsyncpa [#allocation4], 1 }
 0x33e   :  { %855 = vsyncpa [#allocation4 + $0x1], 1 }

</bundles_post_ra>
